<compile_context>
chip_gen: v5e
topology: v5e:2x2
jax: 0.10.0
libtpu: 0.0.40
codegen_flags: <defaults>
</compile_context>

<pallas_src>
import math
import functools

import jax
import jax.numpy as jnp
from jax.experimental import pallas as pl
from jax.experimental.pallas import tpu as pltpu


# -----------------------------------------------------------------------------
# sizing helpers (generation-aware)
# -----------------------------------------------------------------------------
def _vmem_plan():
    """Returns (vmem_limit_bytes, block_budget_bytes) for the current TPU generation."""
    cap = 64 * 1024 * 1024                    # conservative default (v7x per-TC VMEM)
    try:
        cap = int(pltpu.get_tpu_info().vmem_capacity_bytes)
    except Exception:
        pass
    # ~48 MiB on v7x (64 MiB physical), ~96 MiB on v5e/v6e (128 MiB physical).
    limit = max(32 * 1024 * 1024, min(int(cap * 0.75), cap - (16 * 1024 * 1024)))
    budget = int(limit * 0.75)                # headroom for compiler-internal scratch
    return limit, budget


def _pick_tile(length, target):
    """Largest 128-multiple divisor of `length` <= target, or the full length."""
    if length <= target:
        return length
    t = (target // 128) * 128
    while t >= 128:
        if length % t == 0:
            return t
        t -= 128
    return length        # fall back to untiled if no lane-aligned divisor exists


def _pick_group(n_heads, per_head_bytes, shared_bytes, budget_bytes, cap=16):
    """Largest head-group G dividing B*H whose estimated VMEM footprint fits the budget."""
    best = 1
    for g in range(1, min(n_heads, cap) + 1):
        if n_heads % g == 0 and shared_bytes + g * per_head_bytes <= budget_bytes:
            best = g
    return best


# -----------------------------------------------------------------------------
# Kernel 1: ProbSparse sparsity measure
#   M[i] = max_{j sampled for i} (q_i . k_j) - (1/L_k) * sum_t (q_i . k_{idx[i,t]})
# Full Q@K^T on the MXU (bf16 operands, f32 accumulation), tiled over (L_q, L_k) with
# running max / cnt-weighted-sum accumulators in VMEM scratch.
# -----------------------------------------------------------------------------
def _sparsity_kernel(q_ref, k_ref, cnt_ref, m_ref, max_sc, sum_sc, *, inv_L_k):
    # q_ref: (G, TQ, D) bf16   k_ref: (G, TK, D) bf16   cnt_ref: (TQ, TK) bf16
    # m_ref: (G, TQ) f32       max_sc/sum_sc: (G, TQ) f32 scratch
    ki = pl.program_id(2)
    neg = jnp.finfo(jnp.float32).min

    @pl.when(ki == 0)
    def _():
        max_sc[...] = jnp.full_like(max_sc, neg)
        sum_sc[...] = jnp.zeros_like(sum_sc)

    q = q_ref[...]
    k = k_ref[...]
    cnt = cnt_ref[...].astype(jnp.float32)                       # sampling multiplicities

    # bf16 operands -> MXU, f32 accumulation (HIGHEST emulation dropped per review).
    s = jnp.einsum("gqd,gkd->gqk", q, k,
                   preferred_element_type=jnp.float32)           # (G, TQ, TK)
    sampled = (cnt > 0.0)[None]
    tile_max = jnp.max(jnp.where(sampled, s, neg), axis=-1)      # (G, TQ)
    tile_sum = jnp.sum(s * cnt[None], axis=-1)                   # duplicates counted

    max_sc[...] = jnp.maximum(max_sc[...], tile_max)
    sum_sc[...] = sum_sc[...] + tile_sum

    @pl.when(ki == pl.num_programs(2) - 1)
    def _():
        m_ref[...] = max_sc[...] - sum_sc[...] * inv_L_k


def prob_sparsity_measure(q16, k16, cnt, group, tq, tk, vmem_limit):
    BH, L_q, D = q16.shape
    L_k = k16.shape[1]
    kern = functools.partial(_sparsity_kernel, inv_L_k=1.0 / L_k)
    return pl.pallas_call(
        kern,
        out_shape=jax.ShapeDtypeStruct((BH, L_q), jnp.float32),
        grid=(BH // group, L_q // tq, L_k // tk),
        in_specs=[
            pl.BlockSpec((group, tq, D), lambda i, qi, ki: (i, qi, 0)),
            pl.BlockSpec((group, tk, D), lambda i, qi, ki: (i, ki, 0)),
            pl.BlockSpec((tq, tk), lambda i, qi, ki: (qi, ki)),
        ],
        out_specs=pl.BlockSpec((group, tq), lambda i, qi, ki: (i, qi)),
        scratch_shapes=[pltpu.VMEM((group, tq), jnp.float32),
                        pltpu.VMEM((group, tq), jnp.float32)],
        compiler_params=pltpu.CompilerParams(
            dimension_semantics=("parallel", "parallel", "arbitrary"),
            vmem_limit_bytes=vmem_limit,
        ),
    )(q16, k16, cnt)


# -----------------------------------------------------------------------------
# Kernel 2: sparse attention for the selected queries fused with the scatter of the
# context back into V.  V is aliased to the output; the full block is passed through in
# VMEM and only the U selected rows per head are overwritten with dynamic row stores.
# -----------------------------------------------------------------------------
def _sparse_attn_scatter_kernel(idx_ref, q_ref, k_ref, v_ref, o_ref, *, scale, group):
    # idx_ref: (BH, U) int32 in SMEM   q_ref: (G, U, D)   k_ref/v_ref/o_ref: (G, L_v, D)
    q = q_ref[...]
    k = k_ref[...]
    v = v_ref[...]
    n_sel = q.shape[1]

    # softmax(q_red K^T / sqrt(D)) for the selected queries (MXU + EUP reciprocal)
    s = jnp.einsum("gud,gkd->guk", q, k,
                   preferred_element_type=jnp.float32) * scale          # (G, U, L_v)
    s_max = jnp.max(s, axis=-1, keepdims=True)
    e = jnp.exp(s - s_max)
    denom = jnp.sum(e, axis=-1, keepdims=True)
    p = e * pl.reciprocal(denom, approx=True)                           # (G, U, L_v)

    ctx = jnp.einsum("guk,gkd->gud", p.astype(v.dtype), v,
                     preferred_element_type=jnp.float32).astype(o_ref.dtype)  # (G, U, D)

    # pass V through in VMEM, then overwrite only the selected rows (no one-hot matmul,
    # no iota compare, no blend over (G, L_v, D)).
    o_ref[...] = v
    base = pl.program_id(0) * group
    # TODO(synk): the remaining full-block writeback could be replaced by per-row DMAs to
    #             an ANY-space aliased output to cut ~1/3 of kernel-2 HBM traffic.
    for g in range(group):                       # static unroll over heads in the group
        for u in range(n_sel):                   # U is tiny (~factor*ceil(log L_q))
            row = idx_ref[base + g, u]           # scalar read from SMEM
            o_ref[g, pl.ds(row, 1), :] = ctx[g, u][None, :]


def sparse_attention_update(m_top, q_red, k_bh, v_bh, scale, group, vmem_limit):
    BH, U, D = q_red.shape
    L_v = v_bh.shape[1]
    kern = functools.partial(_sparse_attn_scatter_kernel, scale=scale, group=group)
    return pl.pallas_call(
        kern,
        out_shape=jax.ShapeDtypeStruct((BH, L_v, D), v_bh.dtype),
        grid=(BH // group,),
        in_specs=[
            pl.BlockSpec(memory_space=pltpu.MemorySpace.SMEM),          # row indices
            pl.BlockSpec((group, U, D), lambda i: (i, 0, 0)),
            pl.BlockSpec((group, L_v, D), lambda i: (i, 0, 0)),
            pl.BlockSpec((group, L_v, D), lambda i: (i, 0, 0)),
        ],
        out_specs=pl.BlockSpec((group, L_v, D), lambda i: (i, 0, 0)),
        # V's HBM buffer is donated to the output: untouched rows are copied through in
        # VMEM, only the selected rows receive new values.
        input_output_aliases={3: 0},
        compiler_params=pltpu.CompilerParams(
            dimension_semantics=("parallel",),
            vmem_limit_bytes=vmem_limit,
        ),
    )(m_top, q_red, k_bh, v_bh)


# -----------------------------------------------------------------------------
# Full forward (mirrors ProbAttention.forward)
# -----------------------------------------------------------------------------
def prob_attention_forward(q, k, v, attn_mask=None, *, factor=2, key=None):
    """q, k, v: (B, L, H, D) like the PyTorch module.  Returns (B, L_v, H, D)."""
    del attn_mask  # mask_flag / attn_mask path is not exercised by the reference forward
    B, L_q, H, D = q.shape
    L_k = k.shape[1]
    # NOTE: like the PyTorch module, the context scatter below assumes L_q == L_k.

    # TODO(synk): these (B,L,H,D)->(BH,L,D) transposes are extra HBM passes; they could be
    #             folded into the BlockSpec index maps (grid over (B, H-group)) at the
    #             cost of in-kernel layout shuffles.
    q_bh = jnp.transpose(q, (0, 2, 1, 3)).reshape(B * H, L_q, D)
    k_bh = jnp.transpose(k, (0, 2, 1, 3)).reshape(B * H, L_k, D)
    v_bh = jnp.transpose(v, (0, 2, 1, 3)).reshape(B * H, L_k, D)

    u_part = min(int(factor * math.ceil(math.log(L_k))), L_k)
    u = min(int(factor * math.ceil(math.log(L_q))), L_q)

    # random key-sample shared across (B, H), like torch.randint(L_k, (L_q, u_part))
    idx_sample = jax.random.randint(key, (L_q, u_part), 0, L_k)
    # multiplicity matrix cnt[i, j] = #times key j was sampled for query i, built with a
    # scatter-add (no (L_q, u_part, L_k) one-hot slab) and stored narrow (bf16).
    cnt = (jnp.zeros((L_q, L_k), jnp.float32)
           .at[jnp.arange(L_q)[:, None], idx_sample].add(1.0)
           .astype(jnp.bfloat16))

    vmem_limit, budget = _vmem_plan()

    # ----- kernel 1: sparsity measure M (bf16 operands, tiled over L_q / L_k) -----
    tq = _pick_tile(L_q, 512)
    tk = _pick_tile(L_k, 1024)
    per_head_k1 = (4 * tq * D        # q bf16, double-buffered
                   + 4 * tk * D      # k bf16, double-buffered
                   + 16 * tq         # M out (x2 buffers) + two f32 scratches
                   + 4 * tq * tk)    # live f32 score tile
    shared_k1 = 4 * tq * tk          # cnt bf16, double-buffered
    group1 = _pick_group(B * H, per_head_k1, shared_k1, budget)

    q16 = q_bh.astype(jnp.bfloat16)
    k16 = k_bh.astype(jnp.bfloat16)
    M = prob_sparsity_measure(q16, k16, cnt, group1, tq, tk, vmem_limit)   # (BH, L_q)

    # TODO(synk): top-k selection has no clean Pallas equivalent; done with lax.top_k.
    _, M_top = jax.lax.top_k(M, u)                                # (BH, u) int32
    q_red = jnp.take_along_axis(q_bh, M_top[:, :, None], axis=1)  # (BH, u, D) tiny gather

    # ----- kernel 2: sparse attention + in-VMEM row scatter into aliased V -----
    per_head_k2 = (8 * u * D         # q_red f32, double-buffered
                   + 24 * L_k * D    # k, v, out f32, double-buffered
                   + 12 * u * L_k    # score temporaries
                   + 4 * u * D)      # ctx
    group2 = _pick_group(B * H, per_head_k2, 0, budget)

    scale = 1.0 / math.sqrt(D)
    out_bh = sparse_attention_update(M_top, q_red, k_bh, v_bh, scale, group2, vmem_limit)

    out = out_bh.reshape(B, H, L_k, D)
    return jnp.transpose(out, (0, 2, 1, 3))                       # (B, L_v, H, D)


# -----------------------------------------------------------------------------
# Pure-JAX reference (mirrors the PyTorch code path) for a sanity check.
# The sampled-score stage uses the same bf16 operands as kernel 1 so the discrete top-k
# selection is deterministic across both paths (sampled scores via full QK^T + gather is
# algebraically identical to PyTorch's gather-then-matmul); everything else is f32.
# -----------------------------------------------------------------------------
def _reference_forward(q, k, v, *, factor, key):
    B, L_q, H, D = q.shape
    L_k = k.shape[1]
    qt = jnp.transpose(q, (0, 2, 1, 3))
    kt = jnp.transpose(k, (0, 2, 1, 3))
    vt = jnp.transpose(v, (0, 2, 1, 3))
    u_part = min(int(factor * math.ceil(math.log(L_k))), L_k)
    u = min(int(factor * math.ceil(math.log(L_q))), L_q)
    idx = jax.random.randint(key, (L_q, u_part), 0, L_k)
    s_full = jnp.einsum('bhqd,bhkd->bhqk',
                        qt.astype(jnp.bfloat16), kt.astype(jnp.bfloat16),
                        preferred_element_type=jnp.float32)
    s_samp = s_full[:, :, jnp.arange(L_q)[:, None], idx]          # (B, H, L_q, u_part)
    M = s_samp.max(-1) - s_samp.sum(-1) / L_k
    _, M_top = jax.lax.top_k(M, u)                                # (B, H, u)
    b_idx = jnp.arange(B)[:, None, None]
    h_idx = jnp.arange(H)[None, :, None]
    q_red = qt[b_idx, h_idx, M_top, :]                            # (B, H, u, D)
    scores = jnp.einsum('bhud,bhkd->bhuk', q_red, kt) / math.sqrt(D)
    p = jax.nn.softmax(scores, axis=-1)
    ctx = jnp.einsum('bhuk,bhkd->bhud', p, vt)
    v_upd = vt.at[b_idx, h_idx, M_top, :].set(ctx.astype(vt.dtype))
    return jnp.transpose(v_upd, (0, 2, 1, 3))


if __name__ == "__main__":
    root = jax.random.PRNGKey(0)
    kq, kk, kv, ksamp = jax.random.split(root, 4)

    B, L, H, D = 2, 8, 2, 32                         # L_q = L_k = 8
    factor = 2                                       # -> u = u_part = 6

    q = jax.random.normal(kq, (B, L, H, D), dtype=jnp.float32)
    k = jax.random.normal(kk, (B, L, H, D), dtype=jnp.float32)
    v = jax.random.normal(kv, (B, L, H, D), dtype=jnp.float32)

    fwd = jax.jit(lambda q_, k_, v_, key_: prob_attention_forward(
        q_, k_, v_, None, factor=factor, key=key_))
    out = jax.block_until_ready(fwd(q, k, v, ksamp))

    ref = _reference_forward(q, k, v, factor=factor, key=ksamp)

    assert out.shape == (B, L, H, D), out.shape
    assert bool(jnp.all(jnp.isfinite(out)))
    max_diff = float(jnp.max(jnp.abs(out - ref)))
    assert max_diff < 5e-2, f"max diff {max_diff}"

    print("KERNEL_OK")
</pallas_src>

<mosaic_0001>
module attributes {stable_mosaic.version = 11 : i64} {
  func.func @_sparsity_kernel(%arg0: i32, %arg1: i32, %arg2: i32, %arg3: memref<4x8x32xbf16, #tpu.memory_space<vmem>>, %arg4: memref<4x8x32xbf16, #tpu.memory_space<vmem>>, %arg5: memref<8x8xbf16, #tpu.memory_space<vmem>>, %arg6: memref<4x8xf32, #tpu.memory_space<vmem>>, %arg7: memref<4x8xf32, #tpu.memory_space<vmem>>, %arg8: memref<4x8xf32, #tpu.memory_space<vmem>>) attributes {dimension_semantics = [#tpu.dimension_semantics<parallel>, #tpu.dimension_semantics<parallel>, #tpu.dimension_semantics<arbitrary>], iteration_bounds = array<i64: 1, 1, 1>, scalar_prefetch = 0 : i64, scratch_operands = 2 : i64, tpu.core_type = #tpu.core_type<tc>, window_params = [{transform_indices = @transform_0, window_bounds = array<i64: 4, 8, 32>}, {transform_indices = @transform_1, window_bounds = array<i64: 4, 8, 32>}, {transform_indices = @transform_2, window_bounds = array<i64: 8, 8>}, {transform_indices = @transform_3, window_bounds = array<i64: 4, 8>}]} {
    %c0_i32 = arith.constant 0 : i32
    %0 = arith.cmpi eq, %arg2, %c0_i32 : i32
    %1 = arith.extui %0 : i1 to i32
    %c0_i32_0 = arith.constant 0 : i32
    %2 = arith.cmpi ne, %1, %c0_i32_0 : i32
    scf.if %2 {
      %cst_22 = arith.constant -3.40282347E+38 : f32
      %29 = vector.broadcast %cst_22 : f32 to vector<4x8xf32>
      %c0_23 = arith.constant 0 : index
      %c0_24 = arith.constant 0 : index
      %30 = vector.load %arg7[%c0_23, %c0_24] : memref<4x8xf32, #tpu.memory_space<vmem>>, vector<4x8xf32>
      tpu.vector_store %arg7[%c0_23, %c0_24], %29 {strides = array<i32>} : memref<4x8xf32, #tpu.memory_space<vmem>>, vector<4x8xf32>,
      %cst_25 = arith.constant 0.000000e+00 : f32
      %31 = vector.broadcast %cst_25 : f32 to vector<4x8xf32>
      %c0_26 = arith.constant 0 : index
      %c0_27 = arith.constant 0 : index
      %32 = vector.load %arg8[%c0_26, %c0_27] : memref<4x8xf32, #tpu.memory_space<vmem>>, vector<4x8xf32>
      tpu.vector_store %arg8[%c0_26, %c0_27], %31 {strides = array<i32>} : memref<4x8xf32, #tpu.memory_space<vmem>>, vector<4x8xf32>,
    } else {
    }
    %c0 = arith.constant 0 : index
    %c0_1 = arith.constant 0 : index
    %c0_2 = arith.constant 0 : index
    %3 = vector.load %arg3[%c0, %c0_1, %c0_2] : memref<4x8x32xbf16, #tpu.memory_space<vmem>>, vector<4x8x32xbf16>
    %c0_3 = arith.constant 0 : index
    %c0_4 = arith.constant 0 : index
    %c0_5 = arith.constant 0 : index
    %4 = vector.load %arg4[%c0_3, %c0_4, %c0_5] : memref<4x8x32xbf16, #tpu.memory_space<vmem>>, vector<4x8x32xbf16>
    %c0_6 = arith.constant 0 : index
    %c0_7 = arith.constant 0 : index
    %5 = vector.load %arg5[%c0_6, %c0_7] : memref<8x8xbf16, #tpu.memory_space<vmem>>, vector<8x8xbf16>
    %6 = arith.extf %5 : vector<8x8xbf16> to vector<8x8xf32>
    "tpu.trace_start"() <{level = 10 : i32, message = "gqd,gkd->gqk"}> : () -> ()
    %cst = arith.constant dense<0.000000e+00> : vector<4x8x8xf32>
    %7 = tpu.matmul %3, %4, %cst {dimension_numbers = #tpu.dot_dimension_numbers<[2], [2], [1], [1], [0, 0, 0, 1, 1, 1], [0], [0]>} : vector<4x8x32xbf16>, vector<4x8x32xbf16>, vector<4x8x8xf32> -> vector<4x8x8xf32>
    %cst_8 = arith.constant 0.000000e+00 : f32
    "tpu.trace_stop"() : () -> ()
    %8 = vector.broadcast %cst_8 : f32 to vector<8x8xf32>
    %9 = arith.cmpf ogt, %6, %8 : vector<8x8xf32>
    %10 = vector.shape_cast %9 : vector<8x8xi1> to vector<1x8x8xi1>
    %cst_9 = arith.constant -3.40282347E+38 : f32
    %11 = vector.shape_cast %10 : vector<1x8x8xi1> to vector<1x8x8xi1>
    %12 = vector.broadcast %11 : vector<1x8x8xi1> to vector<4x8x8xi1>
    %13 = vector.broadcast %cst_9 : f32 to vector<4x8x8xf32>
    %14 = arith.select %12, %7, %13 : vector<4x8x8xi1>, vector<4x8x8xf32>
    %cst_10 = arith.constant dense<0xFF800000> : vector<4x8xf32>
    %15 = vector.multi_reduction <maximumf>, %14, %cst_10 [2] : vector<4x8x8xf32> to vector<4x8xf32>
    %16 = vector.shape_cast %6 : vector<8x8xf32> to vector<1x8x8xf32>
    %17 = vector.broadcast %16 : vector<1x8x8xf32> to vector<4x8x8xf32>
    %18 = arith.mulf %7, %17 : vector<4x8x8xf32>
    %cst_11 = arith.constant dense<0.000000e+00> : vector<4x8xf32>
    %19 = vector.multi_reduction <add>, %18, %cst_11 [2] : vector<4x8x8xf32> to vector<4x8xf32>
    %c0_12 = arith.constant 0 : index
    %c0_13 = arith.constant 0 : index
    %20 = vector.load %arg7[%c0_12, %c0_13] : memref<4x8xf32, #tpu.memory_space<vmem>>, vector<4x8xf32>
    %21 = arith.maximumf %20, %15 : vector<4x8xf32>
    %c0_14 = arith.constant 0 : index
    %c0_15 = arith.constant 0 : index
    %22 = vector.load %arg7[%c0_14, %c0_15] : memref<4x8xf32, #tpu.memory_space<vmem>>, vector<4x8xf32>
    tpu.vector_store %arg7[%c0_14, %c0_15], %21 {strides = array<i32>} : memref<4x8xf32, #tpu.memory_space<vmem>>, vector<4x8xf32>,
    %c0_16 = arith.constant 0 : index
    %c0_17 = arith.constant 0 : index
    %23 = vector.load %arg8[%c0_16, %c0_17] : memref<4x8xf32, #tpu.memory_space<vmem>>, vector<4x8xf32>
    %24 = arith.addf %23, %19 : vector<4x8xf32>
    %c0_18 = arith.constant 0 : index
    %c0_19 = arith.constant 0 : index
    %25 = vector.load %arg8[%c0_18, %c0_19] : memref<4x8xf32, #tpu.memory_space<vmem>>, vector<4x8xf32>
    tpu.vector_store %arg8[%c0_18, %c0_19], %24 {strides = array<i32>} : memref<4x8xf32, #tpu.memory_space<vmem>>, vector<4x8xf32>,
    %c0_i32_20 = arith.constant 0 : i32
    %26 = arith.cmpi eq, %arg2, %c0_i32_20 : i32
    %27 = arith.extui %26 : i1 to i32
    %c0_i32_21 = arith.constant 0 : i32
    %28 = arith.cmpi ne, %27, %c0_i32_21 : i32
    scf.if %28 {
      %c0_22 = arith.constant 0 : index
      %c0_23 = arith.constant 0 : index
      %29 = vector.load %arg7[%c0_22, %c0_23] : memref<4x8xf32, #tpu.memory_space<vmem>>, vector<4x8xf32>
      %c0_24 = arith.constant 0 : index
      %c0_25 = arith.constant 0 : index
      %30 = vector.load %arg8[%c0_24, %c0_25] : memref<4x8xf32, #tpu.memory_space<vmem>>, vector<4x8xf32>
      %cst_26 = arith.constant 1.250000e-01 : f32
      %31 = vector.broadcast %cst_26 : f32 to vector<4x8xf32>
      %32 = arith.mulf %30, %31 : vector<4x8xf32>
      %33 = arith.subf %29, %32 : vector<4x8xf32>
      %c0_27 = arith.constant 0 : index
      %c0_28 = arith.constant 0 : index
      %34 = vector.load %arg6[%c0_27, %c0_28] : memref<4x8xf32, #tpu.memory_space<vmem>>, vector<4x8xf32>
      tpu.vector_store %arg6[%c0_27, %c0_28], %33 {strides = array<i32>} : memref<4x8xf32, #tpu.memory_space<vmem>>, vector<4x8xf32>,
    } else {
    }
    return
  }
  func.func @transform_0(%arg0: i32, %arg1: i32, %arg2: i32) -> (i32, i32, i32) {
    %c0_i32 = arith.constant 0 : i32
    %c0_i32_0 = arith.constant 0 : i32
    return %arg0, %arg1, %c0_i32 : i32, i32, i32
  }
  func.func @transform_1(%arg0: i32, %arg1: i32, %arg2: i32) -> (i32, i32, i32) {
    %c0_i32 = arith.constant 0 : i32
    %c0_i32_0 = arith.constant 0 : i32
    return %arg0, %arg2, %c0_i32 : i32, i32, i32
  }
  func.func @transform_2(%arg0: i32, %arg1: i32, %arg2: i32) -> (i32, i32) {
    %c0_i32 = arith.constant 0 : i32
    return %arg1, %arg2 : i32, i32
  }
  func.func @transform_3(%arg0: i32, %arg1: i32, %arg2: i32) -> (i32, i32) {
    %c0_i32 = arith.constant 0 : i32
    return %arg0, %arg1 : i32, i32
  }
}

module attributes {stable_mosaic.version = 11 : i64} {
  func.func @_sparse_attn_scatter_kernel(%arg0: i32, %arg1: memref<4x6xi32, #tpu.memory_space<smem>>, %arg2: memref<4x6x32xf32, #tpu.memory_space<vmem>>, %arg3: memref<4x8x32xf32, #tpu.memory_space<vmem>>, %arg4: memref<4x8x32xf32, #tpu.memory_space<vmem>>, %arg5: memref<4x8x32xf32, #tpu.memory_space<vmem>>) attributes {dimension_semantics = [#tpu.dimension_semantics<parallel>], iteration_bounds = array<i64: 1>, scalar_prefetch = 0 : i64, scratch_operands = 0 : i64, tpu.core_type = #tpu.core_type<tc>, window_params = [{transform_indices = @transform_0, window_bounds = array<i64: 4, 6>}, {transform_indices = @transform_1, window_bounds = array<i64: 4, 6, 32>}, {transform_indices = @transform_2, window_bounds = array<i64: 4, 8, 32>}, {transform_indices = @transform_3, window_bounds = array<i64: 4, 8, 32>}, {transform_indices = @transform_4, window_bounds = array<i64: 4, 8, 32>}]} {
    %c0 = arith.constant 0 : index
    %c0_0 = arith.constant 0 : index
    %c0_1 = arith.constant 0 : index
    %0 = vector.load %arg2[%c0, %c0_0, %c0_1] : memref<4x6x32xf32, #tpu.memory_space<vmem>>, vector<4x6x32xf32>
    %c0_2 = arith.constant 0 : index
    %c0_3 = arith.constant 0 : index
    %c0_4 = arith.constant 0 : index
    %1 = vector.load %arg3[%c0_2, %c0_3, %c0_4] : memref<4x8x32xf32, #tpu.memory_space<vmem>>, vector<4x8x32xf32>
    %c0_5 = arith.constant 0 : index
    %c0_6 = arith.constant 0 : index
    %c0_7 = arith.constant 0 : index
    %2 = vector.load %arg4[%c0_5, %c0_6, %c0_7] : memref<4x8x32xf32, #tpu.memory_space<vmem>>, vector<4x8x32xf32>
    "tpu.trace_start"() <{level = 10 : i32, message = "gud,gkd->guk"}> : () -> ()
    %cst = arith.constant dense<0.000000e+00> : vector<4x6x8xf32>
    %3 = tpu.matmul %0, %1, %cst {dimension_numbers = #tpu.dot_dimension_numbers<[2], [2], [1], [1], [0, 0, 0, 1, 1, 1], [0], [0]>} : vector<4x6x32xf32>, vector<4x8x32xf32>, vector<4x6x8xf32> -> vector<4x6x8xf32>
    "tpu.trace_stop"() : () -> ()
    %cst_8 = arith.constant 0.176776692 : f32
    %4 = vector.broadcast %cst_8 : f32 to vector<4x6x8xf32>
    %5 = arith.mulf %3, %4 : vector<4x6x8xf32>
    %cst_9 = arith.constant dense<0xFF800000> : vector<4x6xf32>
    %6 = vector.multi_reduction <maximumf>, %5, %cst_9 [2] : vector<4x6x8xf32> to vector<4x6xf32>
    %7 = vector.shape_cast %6 : vector<4x6xf32> to vector<4x6x1xf32>
    %8 = vector.broadcast %7 : vector<4x6x1xf32> to vector<4x6x8xf32>
    %9 = arith.subf %5, %8 : vector<4x6x8xf32>
    %10 = math.exp %9 : vector<4x6x8xf32>
    %cst_10 = arith.constant dense<0.000000e+00> : vector<4x6xf32>
    %11 = vector.multi_reduction <add>, %10, %cst_10 [2] : vector<4x6x8xf32> to vector<4x6xf32>
    %12 = vector.shape_cast %11 : vector<4x6xf32> to vector<4x6x1xf32>
    %13 = tpu.reciprocal %12 {approx = true} : vector<4x6x1xf32> -> vector<4x6x1xf32>
    %14 = vector.broadcast %13 : vector<4x6x1xf32> to vector<4x6x8xf32>
    %15 = arith.mulf %10, %14 : vector<4x6x8xf32>
    "tpu.trace_start"() <{level = 10 : i32, message = "guk,gkd->gud"}> : () -> ()
    %cst_11 = arith.constant dense<0.000000e+00> : vector<4x6x32xf32>
    %16 = tpu.matmul %15, %2, %cst_11 {dimension_numbers = #tpu.dot_dimension_numbers<[2], [1], [1], [2], [0, 0, 0, 1, 1, 2], [0], [0]>} : vector<4x6x8xf32>, vector<4x8x32xf32>, vector<4x6x32xf32> -> vector<4x6x32xf32>
    "tpu.trace_stop"() : () -> ()
    %c0_12 = arith.constant 0 : index
    %c0_13 = arith.constant 0 : index
    %c0_14 = arith.constant 0 : index
    %17 = vector.load %arg5[%c0_12, %c0_13, %c0_14] : memref<4x8x32xf32, #tpu.memory_space<vmem>>, vector<4x8x32xf32>
    tpu.vector_store %arg5[%c0_12, %c0_13, %c0_14], %2 {strides = array<i32>} : memref<4x8x32xf32, #tpu.memory_space<vmem>>, vector<4x8x32xf32>,
    %c4_i32 = arith.constant 4 : i32
    %18 = arith.muli %arg0, %c4_i32 : i32
    %c0_i32 = arith.constant 0 : i32
    %19 = arith.addi %18, %c0_i32 : i32
    %20 = arith.index_cast %19 : i32 to index
    %c0_15 = arith.constant 0 : index
    %21 = memref.load %arg1[%20, %c0_15] : memref<4x6xi32, #tpu.memory_space<smem>>
    %22 = vector.extract_strided_slice %16 {offsets = [0, 0, 0], sizes = [1, 1, 32], strides = [1, 1, 1]} : vector<4x6x32xf32> to vector<1x1x32xf32>
    %23 = vector.shape_cast %22 : vector<1x1x32xf32> to vector<32xf32>
    %24 = vector.shape_cast %23 : vector<32xf32> to vector<1x32xf32>
    %c0_16 = arith.constant 0 : index
    %25 = arith.index_cast %21 : i32 to index
    %c0_17 = arith.constant 0 : index
    %26 = vector.load %arg5[%c0_16, %25, %c0_17] : memref<4x8x32xf32, #tpu.memory_space<vmem>>, vector<1x1x32xf32>
    %27 = vector.shape_cast %26 : vector<1x1x32xf32> to vector<1x32xf32>
    %28 = vector.shape_cast %24 : vector<1x32xf32> to vector<1x1x32xf32>
    tpu.vector_store %arg5[%c0_16, %25, %c0_17], %28 {strides = array<i32>} : memref<4x8x32xf32, #tpu.memory_space<vmem>>, vector<1x1x32xf32>,
    %c0_i32_18 = arith.constant 0 : i32
    %29 = arith.addi %18, %c0_i32_18 : i32
    %30 = arith.index_cast %29 : i32 to index
    %c1 = arith.constant 1 : index
    %31 = memref.load %arg1[%30, %c1] : memref<4x6xi32, #tpu.memory_space<smem>>
    %32 = vector.extract_strided_slice %16 {offsets = [0, 1, 0], sizes = [1, 1, 32], strides = [1, 1, 1]} : vector<4x6x32xf32> to vector<1x1x32xf32>
    %33 = vector.shape_cast %32 : vector<1x1x32xf32> to vector<32xf32>
    %34 = vector.shape_cast %33 : vector<32xf32> to vector<1x32xf32>
    %c0_19 = arith.constant 0 : index
    %35 = arith.index_cast %31 : i32 to index
    %c0_20 = arith.constant 0 : index
    %36 = vector.load %arg5[%c0_19, %35, %c0_20] : memref<4x8x32xf32, #tpu.memory_space<vmem>>, vector<1x1x32xf32>
    %37 = vector.shape_cast %36 : vector<1x1x32xf32> to vector<1x32xf32>
    %38 = vector.shape_cast %34 : vector<1x32xf32> to vector<1x1x32xf32>
    tpu.vector_store %arg5[%c0_19, %35, %c0_20], %38 {strides = array<i32>} : memref<4x8x32xf32, #tpu.memory_space<vmem>>, vector<1x1x32xf32>,
    %c0_i32_21 = arith.constant 0 : i32
    %39 = arith.addi %18, %c0_i32_21 : i32
    %40 = arith.index_cast %39 : i32 to index
    %c2 = arith.constant 2 : index
    %41 = memref.load %arg1[%40, %c2] : memref<4x6xi32, #tpu.memory_space<smem>>
    %42 = vector.extract_strided_slice %16 {offsets = [0, 2, 0], sizes = [1, 1, 32], strides = [1, 1, 1]} : vector<4x6x32xf32> to vector<1x1x32xf32>
    %43 = vector.shape_cast %42 : vector<1x1x32xf32> to vector<32xf32>
    %44 = vector.shape_cast %43 : vector<32xf32> to vector<1x32xf32>
    %c0_22 = arith.constant 0 : index
    %45 = arith.index_cast %41 : i32 to index
    %c0_23 = arith.constant 0 : index
    %46 = vector.load %arg5[%c0_22, %45, %c0_23] : memref<4x8x32xf32, #tpu.memory_space<vmem>>, vector<1x1x32xf32>
    %47 = vector.shape_cast %46 : vector<1x1x32xf32> to vector<1x32xf32>
    %48 = vector.shape_cast %44 : vector<1x32xf32> to vector<1x1x32xf32>
    tpu.vector_store %arg5[%c0_22, %45, %c0_23], %48 {strides = array<i32>} : memref<4x8x32xf32, #tpu.memory_space<vmem>>, vector<1x1x32xf32>,
    %c0_i32_24 = arith.constant 0 : i32
    %49 = arith.addi %18, %c0_i32_24 : i32
    %50 = arith.index_cast %49 : i32 to index
    %c3 = arith.constant 3 : index
    %51 = memref.load %arg1[%50, %c3] : memref<4x6xi32, #tpu.memory_space<smem>>
    %52 = vector.extract_strided_slice %16 {offsets = [0, 3, 0], sizes = [1, 1, 32], strides = [1, 1, 1]} : vector<4x6x32xf32> to vector<1x1x32xf32>
    %53 = vector.shape_cast %52 : vector<1x1x32xf32> to vector<32xf32>
    %54 = vector.shape_cast %53 : vector<32xf32> to vector<1x32xf32>
    %c0_25 = arith.constant 0 : index
    %55 = arith.index_cast %51 : i32 to index
    %c0_26 = arith.constant 0 : index
    %56 = vector.load %arg5[%c0_25, %55, %c0_26] : memref<4x8x32xf32, #tpu.memory_space<vmem>>, vector<1x1x32xf32>
    %57 = vector.shape_cast %56 : vector<1x1x32xf32> to vector<1x32xf32>
    %58 = vector.shape_cast %54 : vector<1x32xf32> to vector<1x1x32xf32>
    tpu.vector_store %arg5[%c0_25, %55, %c0_26], %58 {strides = array<i32>} : memref<4x8x32xf32, #tpu.memory_space<vmem>>, vector<1x1x32xf32>,
    %c0_i32_27 = arith.constant 0 : i32
    %59 = arith.addi %18, %c0_i32_27 : i32
    %60 = arith.index_cast %59 : i32 to index
    %c4 = arith.constant 4 : index
    %61 = memref.load %arg1[%60, %c4] : memref<4x6xi32, #tpu.memory_space<smem>>
    %62 = vector.extract_strided_slice %16 {offsets = [0, 4, 0], sizes = [1, 1, 32], strides = [1, 1, 1]} : vector<4x6x32xf32> to vector<1x1x32xf32>
    %63 = vector.shape_cast %62 : vector<1x1x32xf32> to vector<32xf32>
    %64 = vector.shape_cast %63 : vector<32xf32> to vector<1x32xf32>
    %c0_28 = arith.constant 0 : index
    %65 = arith.index_cast %61 : i32 to index
    %c0_29 = arith.constant 0 : index
    %66 = vector.load %arg5[%c0_28, %65, %c0_29] : memref<4x8x32xf32, #tpu.memory_space<vmem>>, vector<1x1x32xf32>
    %67 = vector.shape_cast %66 : vector<1x1x32xf32> to vector<1x32xf32>
    %68 = vector.shape_cast %64 : vector<1x32xf32> to vector<1x1x32xf32>
    tpu.vector_store %arg5[%c0_28, %65, %c0_29], %68 {strides = array<i32>} : memref<4x8x32xf32, #tpu.memory_space<vmem>>, vector<1x1x32xf32>,
    %c0_i32_30 = arith.constant 0 : i32
    %69 = arith.addi %18, %c0_i32_30 : i32
    %70 = arith.index_cast %69 : i32 to index
    %c5 = arith.constant 5 : index
    %71 = memref.load %arg1[%70, %c5] : memref<4x6xi32, #tpu.memory_space<smem>>
    %72 = vector.extract_strided_slice %16 {offsets = [0, 5, 0], sizes = [1, 1, 32], strides = [1, 1, 1]} : vector<4x6x32xf32> to vector<1x1x32xf32>
    %73 = vector.shape_cast %72 : vector<1x1x32xf32> to vector<32xf32>
    %74 = vector.shape_cast %73 : vector<32xf32> to vector<1x32xf32>
    %c0_31 = arith.constant 0 : index
    %75 = arith.index_cast %71 : i32 to index
    %c0_32 = arith.constant 0 : index
    %76 = vector.load %arg5[%c0_31, %75, %c0_32] : memref<4x8x32xf32, #tpu.memory_space<vmem>>, vector<1x1x32xf32>
    %77 = vector.shape_cast %76 : vector<1x1x32xf32> to vector<1x32xf32>
    %78 = vector.shape_cast %74 : vector<1x32xf32> to vector<1x1x32xf32>
    tpu.vector_store %arg5[%c0_31, %75, %c0_32], %78 {strides = array<i32>} : memref<4x8x32xf32, #tpu.memory_space<vmem>>, vector<1x1x32xf32>,
    %c1_i32 = arith.constant 1 : i32
    %79 = arith.addi %18, %c1_i32 : i32
    %80 = arith.index_cast %79 : i32 to index
    %c0_33 = arith.constant 0 : index
    %81 = memref.load %arg1[%80, %c0_33] : memref<4x6xi32, #tpu.memory_space<smem>>
    %82 = vector.extract_strided_slice %16 {offsets = [1, 0, 0], sizes = [1, 1, 32], strides = [1, 1, 1]} : vector<4x6x32xf32> to vector<1x1x32xf32>
    %83 = vector.shape_cast %82 : vector<1x1x32xf32> to vector<32xf32>
    %84 = vector.shape_cast %83 : vector<32xf32> to vector<1x32xf32>
    %c1_34 = arith.constant 1 : index
    %85 = arith.index_cast %81 : i32 to index
    %c0_35 = arith.constant 0 : index
    %86 = vector.load %arg5[%c1_34, %85, %c0_35] : memref<4x8x32xf32, #tpu.memory_space<vmem>>, vector<1x1x32xf32>
    %87 = vector.shape_cast %86 : vector<1x1x32xf32> to vector<1x32xf32>
    %88 = vector.shape_cast %84 : vector<1x32xf32> to vector<1x1x32xf32>
    tpu.vector_store %arg5[%c1_34, %85, %c0_35], %88 {strides = array<i32>} : memref<4x8x32xf32, #tpu.memory_space<vmem>>, vector<1x1x32xf32>,
    %c1_i32_36 = arith.constant 1 : i32
    %89 = arith.addi %18, %c1_i32_36 : i32
    %90 = arith.index_cast %89 : i32 to index
    %c1_37 = arith.constant 1 : index
    %91 = memref.load %arg1[%90, %c1_37] : memref<4x6xi32, #tpu.memory_space<smem>>
    %92 = vector.extract_strided_slice %16 {offsets = [1, 1, 0], sizes = [1, 1, 32], strides = [1, 1, 1]} : vector<4x6x32xf32> to vector<1x1x32xf32>
    %93 = vector.shape_cast %92 : vector<1x1x32xf32> to vector<32xf32>
    %94 = vector.shape_cast %93 : vector<32xf32> to vector<1x32xf32>
    %c1_38 = arith.constant 1 : index
    %95 = arith.index_cast %91 : i32 to index
    %c0_39 = arith.constant 0 : index
    %96 = vector.load %arg5[%c1_38, %95, %c0_39] : memref<4x8x32xf32, #tpu.memory_space<vmem>>, vector<1x1x32xf32>
    %97 = vector.shape_cast %96 : vector<1x1x32xf32> to vector<1x32xf32>
    %98 = vector.shape_cast %94 : vector<1x32xf32> to vector<1x1x32xf32>
    tpu.vector_store %arg5[%c1_38, %95, %c0_39], %98 {strides = array<i32>} : memref<4x8x32xf32, #tpu.memory_space<vmem>>, vector<1x1x32xf32>,
    %c1_i32_40 = arith.constant 1 : i32
    %99 = arith.addi %18, %c1_i32_40 : i32
    %100 = arith.index_cast %99 : i32 to index
    %c2_41 = arith.constant 2 : index
    %101 = memref.load %arg1[%100, %c2_41] : memref<4x6xi32, #tpu.memory_space<smem>>
    %102 = vector.extract_strided_slice %16 {offsets = [1, 2, 0], sizes = [1, 1, 32], strides = [1, 1, 1]} : vector<4x6x32xf32> to vector<1x1x32xf32>
    %103 = vector.shape_cast %102 : vector<1x1x32xf32> to vector<32xf32>
    %104 = vector.shape_cast %103 : vector<32xf32> to vector<1x32xf32>
    %c1_42 = arith.constant 1 : index
    %105 = arith.index_cast %101 : i32 to index
    %c0_43 = arith.constant 0 : index
    %106 = vector.load %arg5[%c1_42, %105, %c0_43] : memref<4x8x32xf32, #tpu.memory_space<vmem>>, vector<1x1x32xf32>
    %107 = vector.shape_cast %106 : vector<1x1x32xf32> to vector<1x32xf32>
    %108 = vector.shape_cast %104 : vector<1x32xf32> to vector<1x1x32xf32>
    tpu.vector_store %arg5[%c1_42, %105, %c0_43], %108 {strides = array<i32>} : memref<4x8x32xf32, #tpu.memory_space<vmem>>, vector<1x1x32xf32>,
    %c1_i32_44 = arith.constant 1 : i32
    %109 = arith.addi %18, %c1_i32_44 : i32
    %110 = arith.index_cast %109 : i32 to index
    %c3_45 = arith.constant 3 : index
    %111 = memref.load %arg1[%110, %c3_45] : memref<4x6xi32, #tpu.memory_space<smem>>
    %112 = vector.extract_strided_slice %16 {offsets = [1, 3, 0], sizes = [1, 1, 32], strides = [1, 1, 1]} : vector<4x6x32xf32> to vector<1x1x32xf32>
    %113 = vector.shape_cast %112 : vector<1x1x32xf32> to vector<32xf32>
    %114 = vector.shape_cast %113 : vector<32xf32> to vector<1x32xf32>
    %c1_46 = arith.constant 1 : index
    %115 = arith.index_cast %111 : i32 to index
    %c0_47 = arith.constant 0 : index
    %116 = vector.load %arg5[%c1_46, %115, %c0_47] : memref<4x8x32xf32, #tpu.memory_space<vmem>>, vector<1x1x32xf32>
    %117 = vector.shape_cast %116 : vector<1x1x32xf32> to vector<1x32xf32>
    %118 = vector.shape_cast %114 : vector<1x32xf32> to vector<1x1x32xf32>
    tpu.vector_store %arg5[%c1_46, %115, %c0_47], %118 {strides = array<i32>} : memref<4x8x32xf32, #tpu.memory_space<vmem>>, vector<1x1x32xf32>,
    %c1_i32_48 = arith.constant 1 : i32
    %119 = arith.addi %18, %c1_i32_48 : i32
    %120 = arith.index_cast %119 : i32 to index
    %c4_49 = arith.constant 4 : index
    %121 = memref.load %arg1[%120, %c4_49] : memref<4x6xi32, #tpu.memory_space<smem>>
    %122 = vector.extract_strided_slice %16 {offsets = [1, 4, 0], sizes = [1, 1, 32], strides = [1, 1, 1]} : vector<4x6x32xf32> to vector<1x1x32xf32>
    %123 = vector.shape_cast %122 : vector<1x1x32xf32> to vector<32xf32>
    %124 = vector.shape_cast %123 : vector<32xf32> to vector<1x32xf32>
    %c1_50 = arith.constant 1 : index
    %125 = arith.index_cast %121 : i32 to index
    %c0_51 = arith.constant 0 : index
    %126 = vector.load %arg5[%c1_50, %125, %c0_51] : memref<4x8x32xf32, #tpu.memory_space<vmem>>, vector<1x1x32xf32>
    %127 = vector.shape_cast %126 : vector<1x1x32xf32> to vector<1x32xf32>
    %128 = vector.shape_cast %124 : vector<1x32xf32> to vector<1x1x32xf32>
    tpu.vector_store %arg5[%c1_50, %125, %c0_51], %128 {strides = array<i32>} : memref<4x8x32xf32, #tpu.memory_space<vmem>>, vector<1x1x32xf32>,
    %c1_i32_52 = arith.constant 1 : i32
    %129 = arith.addi %18, %c1_i32_52 : i32
    %130 = arith.index_cast %129 : i32 to index
    %c5_53 = arith.constant 5 : index
    %131 = memref.load %arg1[%130, %c5_53] : memref<4x6xi32, #tpu.memory_space<smem>>
    %132 = vector.extract_strided_slice %16 {offsets = [1, 5, 0], sizes = [1, 1, 32], strides = [1, 1, 1]} : vector<4x6x32xf32> to vector<1x1x32xf32>
    %133 = vector.shape_cast %132 : vector<1x1x32xf32> to vector<32xf32>
    %134 = vector.shape_cast %133 : vector<32xf32> to vector<1x32xf32>
    %c1_54 = arith.constant 1 : index
    %135 = arith.index_cast %131 : i32 to index
    %c0_55 = arith.constant 0 : index
    %136 = vector.load %arg5[%c1_54, %135, %c0_55] : memref<4x8x32xf32, #tpu.memory_space<vmem>>, vector<1x1x32xf32>
    %137 = vector.shape_cast %136 : vector<1x1x32xf32> to vector<1x32xf32>
    %138 = vector.shape_cast %134 : vector<1x32xf32> to vector<1x1x32xf32>
    tpu.vector_store %arg5[%c1_54, %135, %c0_55], %138 {strides = array<i32>} : memref<4x8x32xf32, #tpu.memory_space<vmem>>, vector<1x1x32xf32>,
    %c2_i32 = arith.constant 2 : i32
    %139 = arith.addi %18, %c2_i32 : i32
    %140 = arith.index_cast %139 : i32 to index
    %c0_56 = arith.constant 0 : index
    %141 = memref.load %arg1[%140, %c0_56] : memref<4x6xi32, #tpu.memory_space<smem>>
    %142 = vector.extract_strided_slice %16 {offsets = [2, 0, 0], sizes = [1, 1, 32], strides = [1, 1, 1]} : vector<4x6x32xf32> to vector<1x1x32xf32>
    %143 = vector.shape_cast %142 : vector<1x1x32xf32> to vector<32xf32>
    %144 = vector.shape_cast %143 : vector<32xf32> to vector<1x32xf32>
    %c2_57 = arith.constant 2 : index
    %145 = arith.index_cast %141 : i32 to index
    %c0_58 = arith.constant 0 : index
    %146 = vector.load %arg5[%c2_57, %145, %c0_58] : memref<4x8x32xf32, #tpu.memory_space<vmem>>, vector<1x1x32xf32>
    %147 = vector.shape_cast %146 : vector<1x1x32xf32> to vector<1x32xf32>
    %148 = vector.shape_cast %144 : vector<1x32xf32> to vector<1x1x32xf32>
    tpu.vector_store %arg5[%c2_57, %145, %c0_58], %148 {strides = array<i32>} : memref<4x8x32xf32, #tpu.memory_space<vmem>>, vector<1x1x32xf32>,
    %c2_i32_59 = arith.constant 2 : i32
    %149 = arith.addi %18, %c2_i32_59 : i32
    %150 = arith.index_cast %149 : i32 to index
    %c1_60 = arith.constant 1 : index
    %151 = memref.load %arg1[%150, %c1_60] : memref<4x6xi32, #tpu.memory_space<smem>>
    %152 = vector.extract_strided_slice %16 {offsets = [2, 1, 0], sizes = [1, 1, 32], strides = [1, 1, 1]} : vector<4x6x32xf32> to vector<1x1x32xf32>
    %153 = vector.shape_cast %152 : vector<1x1x32xf32> to vector<32xf32>
    %154 = vector.shape_cast %153 : vector<32xf32> to vector<1x32xf32>
    %c2_61 = arith.constant 2 : index
    %155 = arith.index_cast %151 : i32 to index
    %c0_62 = arith.constant 0 : index
    %156 = vector.load %arg5[%c2_61, %155, %c0_62] : memref<4x8x32xf32, #tpu.memory_space<vmem>>, vector<1x1x32xf32>
    %157 = vector.shape_cast %156 : vector<1x1x32xf32> to vector<1x32xf32>
    %158 = vector.shape_cast %154 : vector<1x32xf32> to vector<1x1x32xf32>
    tpu.vector_store %arg5[%c2_61, %155, %c0_62], %158 {strides = array<i32>} : memref<4x8x32xf32, #tpu.memory_space<vmem>>, vector<1x1x32xf32>,
    %c2_i32_63 = arith.constant 2 : i32
    %159 = arith.addi %18, %c2_i32_63 : i32
    %160 = arith.index_cast %159 : i32 to index
    %c2_64 = arith.constant 2 : index
    %161 = memref.load %arg1[%160, %c2_64] : memref<4x6xi32, #tpu.memory_space<smem>>
    %162 = vector.extract_strided_slice %16 {offsets = [2, 2, 0], sizes = [1, 1, 32], strides = [1, 1, 1]} : vector<4x6x32xf32> to vector<1x1x32xf32>
    %163 = vector.shape_cast %162 : vector<1x1x32xf32> to vector<32xf32>
    %164 = vector.shape_cast %163 : vector<32xf32> to vector<1x32xf32>
    %c2_65 = arith.constant 2 : index
    %165 = arith.index_cast %161 : i32 to index
    %c0_66 = arith.constant 0 : index
    %166 = vector.load %arg5[%c2_65, %165, %c0_66] : memref<4x8x32xf32, #tpu.memory_space<vmem>>, vector<1x1x32xf32>
    %167 = vector.shape_cast %166 : vector<1x1x32xf32> to vector<1x32xf32>
    %168 = vector.shape_cast %164 : vector<1x32xf32> to vector<1x1x32xf32>
    tpu.vector_store %arg5[%c2_65, %165, %c0_66], %168 {strides = array<i32>} : memref<4x8x32xf32, #tpu.memory_space<vmem>>, vector<1x1x32xf32>,
    %c2_i32_67 = arith.constant 2 : i32
    %169 = arith.addi %18, %c2_i32_67 : i32
    %170 = arith.index_cast %169 : i32 to index
    %c3_68 = arith.constant 3 : index
    %171 = memref.load %arg1[%170, %c3_68] : memref<4x6xi32, #tpu.memory_space<smem>>
    %172 = vector.extract_strided_slice %16 {offsets = [2, 3, 0], sizes = [1, 1, 32], strides = [1, 1, 1]} : vector<4x6x32xf32> to vector<1x1x32xf32>
    %173 = vector.shape_cast %172 : vector<1x1x32xf32> to vector<32xf32>
    %174 = vector.shape_cast %173 : vector<32xf32> to vector<1x32xf32>
    %c2_69 = arith.constant 2 : index
    %175 = arith.index_cast %171 : i32 to index
    %c0_70 = arith.constant 0 : index
    %176 = vector.load %arg5[%c2_69, %175, %c0_70] : memref<4x8x32xf32, #tpu.memory_space<vmem>>, vector<1x1x32xf32>
    %177 = vector.shape_cast %176 : vector<1x1x32xf32> to vector<1x32xf32>
    %178 = vector.shape_cast %174 : vector<1x32xf32> to vector<1x1x32xf32>
    tpu.vector_store %arg5[%c2_69, %175, %c0_70], %178 {strides = array<i32>} : memref<4x8x32xf32, #tpu.memory_space<vmem>>, vector<1x1x32xf32>,
    %c2_i32_71 = arith.constant 2 : i32
    %179 = arith.addi %18, %c2_i32_71 : i32
    %180 = arith.index_cast %179 : i32 to index
    %c4_72 = arith.constant 4 : index
    %181 = memref.load %arg1[%180, %c4_72] : memref<4x6xi32, #tpu.memory_space<smem>>
    %182 = vector.extract_strided_slice %16 {offsets = [2, 4, 0], sizes = [1, 1, 32], strides = [1, 1, 1]} : vector<4x6x32xf32> to vector<1x1x32xf32>
    %183 = vector.shape_cast %182 : vector<1x1x32xf32> to vector<32xf32>
    %184 = vector.shape_cast %183 : vector<32xf32> to vector<1x32xf32>
    %c2_73 = arith.constant 2 : index
    %185 = arith.index_cast %181 : i32 to index
    %c0_74 = arith.constant 0 : index
    %186 = vector.load %arg5[%c2_73, %185, %c0_74] : memref<4x8x32xf32, #tpu.memory_space<vmem>>, vector<1x1x32xf32>
    %187 = vector.shape_cast %186 : vector<1x1x32xf32> to vector<1x32xf32>
    %188 = vector.shape_cast %184 : vector<1x32xf32> to vector<1x1x32xf32>
    tpu.vector_store %arg5[%c2_73, %185, %c0_74], %188 {strides = array<i32>} : memref<4x8x32xf32, #tpu.memory_space<vmem>>, vector<1x1x32xf32>,
    %c2_i32_75 = arith.constant 2 : i32
    %189 = arith.addi %18, %c2_i32_75 : i32
    %190 = arith.index_cast %189 : i32 to index
    %c5_76 = arith.constant 5 : index
    %191 = memref.load %arg1[%190, %c5_76] : memref<4x6xi32, #tpu.memory_space<smem>>
    %192 = vector.extract_strided_slice %16 {offsets = [2, 5, 0], sizes = [1, 1, 32], strides = [1, 1, 1]} : vector<4x6x32xf32> to vector<1x1x32xf32>
    %193 = vector.shape_cast %192 : vector<1x1x32xf32> to vector<32xf32>
    %194 = vector.shape_cast %193 : vector<32xf32> to vector<1x32xf32>
    %c2_77 = arith.constant 2 : index
    %195 = arith.index_cast %191 : i32 to index
    %c0_78 = arith.constant 0 : index
    %196 = vector.load %arg5[%c2_77, %195, %c0_78] : memref<4x8x32xf32, #tpu.memory_space<vmem>>, vector<1x1x32xf32>
    %197 = vector.shape_cast %196 : vector<1x1x32xf32> to vector<1x32xf32>
    %198 = vector.shape_cast %194 : vector<1x32xf32> to vector<1x1x32xf32>
    tpu.vector_store %arg5[%c2_77, %195, %c0_78], %198 {strides = array<i32>} : memref<4x8x32xf32, #tpu.memory_space<vmem>>, vector<1x1x32xf32>,
    %c3_i32 = arith.constant 3 : i32
    %199 = arith.addi %18, %c3_i32 : i32
    %200 = arith.index_cast %199 : i32 to index
    %c0_79 = arith.constant 0 : index
    %201 = memref.load %arg1[%200, %c0_79] : memref<4x6xi32, #tpu.memory_space<smem>>
    %202 = vector.extract_strided_slice %16 {offsets = [3, 0, 0], sizes = [1, 1, 32], strides = [1, 1, 1]} : vector<4x6x32xf32> to vector<1x1x32xf32>
    %203 = vector.shape_cast %202 : vector<1x1x32xf32> to vector<32xf32>
    %204 = vector.shape_cast %203 : vector<32xf32> to vector<1x32xf32>
    %c3_80 = arith.constant 3 : index
    %205 = arith.index_cast %201 : i32 to index
    %c0_81 = arith.constant 0 : index
    %206 = vector.load %arg5[%c3_80, %205, %c0_81] : memref<4x8x32xf32, #tpu.memory_space<vmem>>, vector<1x1x32xf32>
    %207 = vector.shape_cast %206 : vector<1x1x32xf32> to vector<1x32xf32>
    %208 = vector.shape_cast %204 : vector<1x32xf32> to vector<1x1x32xf32>
    tpu.vector_store %arg5[%c3_80, %205, %c0_81], %208 {strides = array<i32>} : memref<4x8x32xf32, #tpu.memory_space<vmem>>, vector<1x1x32xf32>,
    %c3_i32_82 = arith.constant 3 : i32
    %209 = arith.addi %18, %c3_i32_82 : i32
    %210 = arith.index_cast %209 : i32 to index
    %c1_83 = arith.constant 1 : index
    %211 = memref.load %arg1[%210, %c1_83] : memref<4x6xi32, #tpu.memory_space<smem>>
    %212 = vector.extract_strided_slice %16 {offsets = [3, 1, 0], sizes = [1, 1, 32], strides = [1, 1, 1]} : vector<4x6x32xf32> to vector<1x1x32xf32>
    %213 = vector.shape_cast %212 : vector<1x1x32xf32> to vector<32xf32>
    %214 = vector.shape_cast %213 : vector<32xf32> to vector<1x32xf32>
    %c3_84 = arith.constant 3 : index
    %215 = arith.index_cast %211 : i32 to index
    %c0_85 = arith.constant 0 : index
    %216 = vector.load %arg5[%c3_84, %215, %c0_85] : memref<4x8x32xf32, #tpu.memory_space<vmem>>, vector<1x1x32xf32>
    %217 = vector.shape_cast %216 : vector<1x1x32xf32> to vector<1x32xf32>
    %218 = vector.shape_cast %214 : vector<1x32xf32> to vector<1x1x32xf32>
    tpu.vector_store %arg5[%c3_84, %215, %c0_85], %218 {strides = array<i32>} : memref<4x8x32xf32, #tpu.memory_space<vmem>>, vector<1x1x32xf32>,
    %c3_i32_86 = arith.constant 3 : i32
    %219 = arith.addi %18, %c3_i32_86 : i32
    %220 = arith.index_cast %219 : i32 to index
    %c2_87 = arith.constant 2 : index
    %221 = memref.load %arg1[%220, %c2_87] : memref<4x6xi32, #tpu.memory_space<smem>>
    %222 = vector.extract_strided_slice %16 {offsets = [3, 2, 0], sizes = [1, 1, 32], strides = [1, 1, 1]} : vector<4x6x32xf32> to vector<1x1x32xf32>
    %223 = vector.shape_cast %222 : vector<1x1x32xf32> to vector<32xf32>
    %224 = vector.shape_cast %223 : vector<32xf32> to vector<1x32xf32>
    %c3_88 = arith.constant 3 : index
    %225 = arith.index_cast %221 : i32 to index
    %c0_89 = arith.constant 0 : index
    %226 = vector.load %arg5[%c3_88, %225, %c0_89] : memref<4x8x32xf32, #tpu.memory_space<vmem>>, vector<1x1x32xf32>
    %227 = vector.shape_cast %226 : vector<1x1x32xf32> to vector<1x32xf32>
    %228 = vector.shape_cast %224 : vector<1x32xf32> to vector<1x1x32xf32>
    tpu.vector_store %arg5[%c3_88, %225, %c0_89], %228 {strides = array<i32>} : memref<4x8x32xf32, #tpu.memory_space<vmem>>, vector<1x1x32xf32>,
    %c3_i32_90 = arith.constant 3 : i32
    %229 = arith.addi %18, %c3_i32_90 : i32
    %230 = arith.index_cast %229 : i32 to index
    %c3_91 = arith.constant 3 : index
    %231 = memref.load %arg1[%230, %c3_91] : memref<4x6xi32, #tpu.memory_space<smem>>
    %232 = vector.extract_strided_slice %16 {offsets = [3, 3, 0], sizes = [1, 1, 32], strides = [1, 1, 1]} : vector<4x6x32xf32> to vector<1x1x32xf32>
    %233 = vector.shape_cast %232 : vector<1x1x32xf32> to vector<32xf32>
    %234 = vector.shape_cast %233 : vector<32xf32> to vector<1x32xf32>
    %c3_92 = arith.constant 3 : index
    %235 = arith.index_cast %231 : i32 to index
    %c0_93 = arith.constant 0 : index
    %236 = vector.load %arg5[%c3_92, %235, %c0_93] : memref<4x8x32xf32, #tpu.memory_space<vmem>>, vector<1x1x32xf32>
    %237 = vector.shape_cast %236 : vector<1x1x32xf32> to vector<1x32xf32>
    %238 = vector.shape_cast %234 : vector<1x32xf32> to vector<1x1x32xf32>
    tpu.vector_store %arg5[%c3_92, %235, %c0_93], %238 {strides = array<i32>} : memref<4x8x32xf32, #tpu.memory_space<vmem>>, vector<1x1x32xf32>,
    %c3_i32_94 = arith.constant 3 : i32
    %239 = arith.addi %18, %c3_i32_94 : i32
    %240 = arith.index_cast %239 : i32 to index
    %c4_95 = arith.constant 4 : index
    %241 = memref.load %arg1[%240, %c4_95] : memref<4x6xi32, #tpu.memory_space<smem>>
    %242 = vector.extract_strided_slice %16 {offsets = [3, 4, 0], sizes = [1, 1, 32], strides = [1, 1, 1]} : vector<4x6x32xf32> to vector<1x1x32xf32>
    %243 = vector.shape_cast %242 : vector<1x1x32xf32> to vector<32xf32>
    %244 = vector.shape_cast %243 : vector<32xf32> to vector<1x32xf32>
    %c3_96 = arith.constant 3 : index
    %245 = arith.index_cast %241 : i32 to index
    %c0_97 = arith.constant 0 : index
    %246 = vector.load %arg5[%c3_96, %245, %c0_97] : memref<4x8x32xf32, #tpu.memory_space<vmem>>, vector<1x1x32xf32>
    %247 = vector.shape_cast %246 : vector<1x1x32xf32> to vector<1x32xf32>
    %248 = vector.shape_cast %244 : vector<1x32xf32> to vector<1x1x32xf32>
    tpu.vector_store %arg5[%c3_96, %245, %c0_97], %248 {strides = array<i32>} : memref<4x8x32xf32, #tpu.memory_space<vmem>>, vector<1x1x32xf32>,
    %c3_i32_98 = arith.constant 3 : i32
    %249 = arith.addi %18, %c3_i32_98 : i32
    %250 = arith.index_cast %249 : i32 to index
    %c5_99 = arith.constant 5 : index
    %251 = memref.load %arg1[%250, %c5_99] : memref<4x6xi32, #tpu.memory_space<smem>>
    %252 = vector.extract_strided_slice %16 {offsets = [3, 5, 0], sizes = [1, 1, 32], strides = [1, 1, 1]} : vector<4x6x32xf32> to vector<1x1x32xf32>
    %253 = vector.shape_cast %252 : vector<1x1x32xf32> to vector<32xf32>
    %254 = vector.shape_cast %253 : vector<32xf32> to vector<1x32xf32>
    %c3_100 = arith.constant 3 : index
    %255 = arith.index_cast %251 : i32 to index
    %c0_101 = arith.constant 0 : index
    %256 = vector.load %arg5[%c3_100, %255, %c0_101] : memref<4x8x32xf32, #tpu.memory_space<vmem>>, vector<1x1x32xf32>
    %257 = vector.shape_cast %256 : vector<1x1x32xf32> to vector<1x32xf32>
    %258 = vector.shape_cast %254 : vector<1x32xf32> to vector<1x1x32xf32>
    tpu.vector_store %arg5[%c3_100, %255, %c0_101], %258 {strides = array<i32>} : memref<4x8x32xf32, #tpu.memory_space<vmem>>, vector<1x1x32xf32>,
    return
  }
  func.func @transform_0(%arg0: i32) -> (i32, i32) {
    %c0_i32 = arith.constant 0 : i32
    %c0_i32_0 = arith.constant 0 : i32
    %c0_i32_1 = arith.constant 0 : i32
    return %c0_i32, %c0_i32_0 : i32, i32
  }
  func.func @transform_1(%arg0: i32) -> (i32, i32, i32) {
    %c0_i32 = arith.constant 0 : i32
    %c0_i32_0 = arith.constant 0 : i32
    %c0_i32_1 = arith.constant 0 : i32
    return %arg0, %c0_i32, %c0_i32_0 : i32, i32, i32
  }
  func.func @transform_2(%arg0: i32) -> (i32, i32, i32) {
    %c0_i32 = arith.constant 0 : i32
    %c0_i32_0 = arith.constant 0 : i32
    %c0_i32_1 = arith.constant 0 : i32
    return %arg0, %c0_i32, %c0_i32_0 : i32, i32, i32
  }
  func.func @transform_3(%arg0: i32) -> (i32, i32, i32) {
    %c0_i32 = arith.constant 0 : i32
    %c0_i32_0 = arith.constant 0 : i32
    %c0_i32_1 = arith.constant 0 : i32
    return %arg0, %c0_i32, %c0_i32_0 : i32, i32, i32
  }
  func.func @transform_4(%arg0: i32) -> (i32, i32, i32) {
    %c0_i32 = arith.constant 0 : i32
    %c0_i32_0 = arith.constant 0 : i32
    %c0_i32_1 = arith.constant 0 : i32
    return %arg0, %c0_i32, %c0_i32_0 : i32, i32, i32
  }
}

</mosaic_0001>

<bundles_post_ra>
// kernel: _lambda_.2
= control target key start
LH: loop header
LB: loop body
LE: loop exit
PB: predicated region body
PF: predicated region fallthrough
CT: control target
= control target key end

     0   :  { %vm32_vm0 = vcmask 261120   ;;  %vm116_vm2 = vcmask 64512   ;;  %vm19_vm3 = vcmask 60416   ;;  %v199_v38 = vmov 0.0   ;;  %s280_s1 = inlined_call_operand.vmem [shape: bf16[4,8,32], index: 1, kind: input, shape index: {}]   ;;  %s281_s0 = inlined_call_operand.vmem [shape: bf16[4,8,32], index: 0, kind: input, shape index: {}]   ;;  %s282_s2 = inlined_call_operand.vmem [shape: bf16[8,8], index: 2, kind: input, shape index: {}]   ;;  %s283_s3 = inlined_call_operand.vmem [shape: f32[4,8], index: 3, kind: output, shape index: {}]  }
   0x1   :  { %v26_v0 = vld [vmem:[%s280_s1] sm:$0xf]  ;;  %v27_v1 = vld [vmem:[%s280_s1 + $0x4] sm:$0xf]  ;;  %v28_v2 = vld [vmem:[%s280_s1 + $0x8] sm:$0xf]  ;;  %v150_v43 = vlaneseq }
   0x2   :  { %v37_v3 = vsel %vm32_vm0, %v26_v0, 0  ;;  %v56_v4 = vsel %vm32_vm0, %v27_v1, 0  ;;  %v75_v5 = vsel %vm32_vm0, %v28_v2, 0  ;;  %v29_v6 = vld [vmem:[%s280_s1 + $0xc] sm:$0xf]  ;;  %vm158_vm4 = vcmask 1042434  }
   0x3   :  { %46 = vmatpush.bf16.xpose.msra.mxu0 %v37_v3  ;;  %65 = vmatpush.bf16.xpose.msra.mxu1 %v56_v4  ;;  %v94_v7 = vsel %vm32_vm0, %v29_v6, 0  ;;  %v22_v8 = vld [vmem:[%s281_s0] sm:$0xf]  ;;  %v23_v9 = vld [vmem:[%s281_s0 + $0x4] sm:$0xf]  ;;  %v151_v44 = vand.u32 127, %v150_v43 }
   0x4   :  { %84 = vmatpush.bf16.xpose.msra.mxu2 %v75_v5  ;;  %103 = vmatpush.bf16.xpose.msra.mxu3 %v94_v7  ;;  %v24_v10 = vld [vmem:[%s281_s0 + $0x8] sm:$0xf]  ;;  %v25_v11 = vld [vmem:[%s281_s0 + $0xc] sm:$0xf]  ;;  %v30_v12 = vld [vmem:[%s282_s2] sm:$0xf] }
   0x5   :  { %v31_v13 = vunpack.c.l.bf16 %v30_v12  ;;  %21 = vst.msk [vmem:[#allocation3] sm:$0xf] %vm19_vm3, %v199_v38  ;;  %v200_v39 = vmov -3.4028235e+38   ;;  %vm156_vm5 = vcmask 1041409   ;;  %vm160_vm6 = vcmask 1043459  }
   0x6   :  { %20 = vst.msk [vmem:[#allocation2] sm:$0xf] %vm19_vm3, %v200_v39 }
   0x7   :  { %vm109_vm1 = vcmp.gt.f32.partialorder %v31_v13, 0.0 }
   0xa   :  { %193 = vmatmul.msk.bf16.vlgmr.msra.gmra.mxu0 %vm32_vm0, %v22_v8  ;;  %194 = vmatmul.msk.bf16.vlgmr.msra.gmra.mxu1 %vm32_vm0, %v23_v9 }
   0xb   :  { %195 = vmatmul.msk.bf16.vlgmr.msra.gmra.mxu2 %vm32_vm0, %v24_v10  ;;  %196 = vmatmul.msk.bf16.vlgmr.msra.gmra.mxu3 %vm32_vm0, %v25_v11 }
   0xc   :  { %v166_v53 = vld [vmem:[#allocation3] sm:$0xf] }
   0xd   :  { %v145_v0 = vld [vmem:[#allocation2] sm:$0xf] }
  0x87   :  { %v48_v14 = vpop.f32.mrf.mxu0  ;;  %v67_v15 = vpop.f32.mrf.mxu1 }
  0x88   :  { %v113_v16 = vsel %vm109_vm1, %v67_v15, -3.4028235e+38  ;;  %v112_v17 = vsel %vm109_vm1, %v48_v14, -3.4028235e+38  ;;  %v129_v18 = vmul.f32 %v48_v14, %v31_v13  ;;  %v130_v22 = vmul.f32 %v67_v15, %v31_v13 }
  0x89   :  { %v120_v19 = vsel %vm116_vm2, %v113_v16, -inf  ;;  %v117_v20 = vsel %vm116_vm2, %v112_v17, -inf }
  0x8a   :  { %121 = vmax.xlane.f32.xlu2 %v120_v19  ;;  %118 = vmax.xlane.f32.xlu1 %v117_v20  ;;  %v133_v21 = vsel %vm116_vm2, %v129_v18, 0.0  ;;  %v136_v29 = vsel %vm116_vm2, %v130_v22, 0.0 }
  0x8b   :  { %134 = vadd.xlane.f32.xlu0 %v133_v21 }
  0x8e   :  { %v86_v23 = vpop.f32.mrf.mxu2  ;;  %v105_v24 = vpop.f32.mrf.mxu3 }
  0x8f   :  { %v131_v25 = vmul.f32 %v86_v23, %v31_v13  ;;  %v132_v26 = vmul.f32 %v105_v24, %v31_v13  ;;  %v50_v27 = vpop.f32.mrf.mxu0  ;;  %v69_v28 = vpop.f32.mrf.mxu1  ;;  %v115_v32 = vsel %vm109_vm1, %v105_v24, -3.4028235e+38  ;;  %v114_v36 = vsel %vm109_vm1, %v86_v23, -3.4028235e+38 }
  0x90   :  { %v126_v35 = vsel %vm116_vm2, %v115_v32, -inf  ;;  %v123_v37 = vsel %vm116_vm2, %v114_v36, -inf }
  0x91   :  { %v139_v30 = vsel %vm116_vm2, %v131_v25, 0.0  ;;  %v142_v31 = vsel %vm116_vm2, %v132_v26, 0.0 }
  0x92   :  { %140 = vadd.xlane.f32.xlu1 %v139_v30  ;;  %143 = vadd.xlane.f32.xlu2 %v142_v31 }
  0x93   :  { %137 = vadd.xlane.f32.xlu0 %v136_v29 }
  0x96   :  { %v88_v33 = vpop.f32.mrf.mxu2  ;;  %v107_v34 = vpop.f32.mrf.mxu3 }
  0x9a   :  { %127 = vmax.xlane.f32.xlu1 %v126_v35 }
  0x9b   :  { %124 = vmax.xlane.f32.xlu0 %v123_v37 }
  0xfd   :  { %v122_v40 = vpop.xlane.xlu2 %121  ;;  %v119_v41 = vpop.xlane.xlu1 %118 }
  0xfe   :  { %v135_v42 = vpop.xlane.xlu0 %134  ;;  %v153_v56 = vperm.slane %v122_v40, %v151_v44  ;;  %v152_v57 = vperm.slane %v119_v41, %v151_v44 }
  0xff   :  { %v171_v49 = vperm.slane %v135_v42, %v151_v44 }
 0x100   :  { %v157_v62 = vsel %vm156_vm5, %v153_v56, %v152_v57 }
 0x105   :  { %v141_v45 = vpop.xlane.xlu1 %140  ;;  %v144_v46 = vpop.xlane.xlu2 %143 }
 0x106   :  { %v173_v47 = vperm.slane %v141_v45, %v151_v44  ;;  %v138_v48 = vpop.xlane.xlu0 %137  ;;  %v174_v51 = vperm.slane %v144_v46, %v151_v44 }
 0x107   :  { %v172_v50 = vperm.slane %v138_v48, %v151_v44 }
 0x109   :  { %v175_v52 = vsel %vm156_vm5, %v172_v50, %v171_v49 }
 0x10a   :  { %v176_v54 = vsel %vm158_vm4, %v173_v47, %v175_v52 }
 0x10b   :  { %v177_v55 = vsel %vm160_vm6, %v174_v51, %v176_v54 }
 0x10c   :  { %v179_v58 = vadd.f32 %v177_v55, %v166_v53 }
 0x10d   :  { %v128_v59 = vpop.xlane.xlu1 %127 }
 0x10e   :  { %180 = vst.msk [vmem:[#allocation3] sm:$0xf] %vm19_vm3, %v179_v58  ;;  %v125_v60 = vpop.xlane.xlu0 %124  ;;  %v155_v63 = vperm.slane %v128_v59, %v151_v44 }
 0x10f   :  { %v154_v61 = vperm.slane %v125_v60, %v151_v44 }
 0x111   :  { %v159_v1 = vsel %vm158_vm4, %v154_v61, %v157_v62 }
 0x112   :  { %v161_v2 = vsel %vm160_vm6, %v155_v63, %v159_v1 }
 0x113   :  { %v163_v3 = vmax.f32 %v145_v0, %v161_v2 }
 0x115   :  { %165 = vst.msk [vmem:[#allocation2] sm:$0xf] %vm19_vm3, %v163_v3  ;;  %v185_v4 = vld [vmem:[#allocation3] sm:$0xf] }
 0x116   :  { %v186_v5 = vmul.f32 0.125, %v185_v4 }
 0x11c   :  { %v184_v6 = vld [vmem:[#allocation2] sm:$0xf] }
 0x11d   :  { %v187_v7 = vsub.f32 %v184_v6, %v186_v5 }
 0x11f   :  { %188 = vst.msk [vmem:[%s283_s3] sm:$0xf] %vm19_vm3, %v187_v7 }

// kernel: _lambda_.3
= control target key start
LH: loop header
LB: loop body
LE: loop exit
PB: predicated region body
PF: predicated region fallthrough
CT: control target
= control target key end

     0   :  { %9 = vsyncpa [#allocation3], 0  ;;  %s548_s18 = smov [#allocation2]   ;;  %s771_s0 = inlined_call_operand.vmem [shape: s32[4,6], index: 0, kind: input, shape index: {}]   ;;  %s772_s1 = inlined_call_operand.vmem [shape: f32[4,6,32], index: 1, kind: input, shape index: {}]   ;;  %s773_s2 = inlined_call_operand.vmem [shape: f32[4,8,32], index: 2, kind: input, shape index: {}]   ;;  %s774_s3 = inlined_call_operand.vmem [shape: f32[4,8,32], index: 3, kind: input, shape index: {}, may-alias: {3,4}]   ;;  %s775_s4 = inlined_call_operand.vmem [shape: f32[4,8,32], index: 4, kind: output, shape index: {}, may-alias: {3,4}]  }
   0x1   :  { %s15_s17 = sshll.u32 %s771_s0, 4  ;;  %s16_s17 = int_to_ptr.vmem [resolvable:$true] %s15_s17 }
   0x2   :  { %18 = dma.vmem_to_smem %s16_s17, 64, %s548_s18, [#allocation3]  }
   0x3   :  { %546 = dma.done.wait [#allocation3], 64  }
   0x4   :  { %547 = vsyncadd [#allocation3], 4294967232 }
   0x5   :  { %29 = sfence }
   0x6   :  { %v34_v0 = vld [vmem:[%s773_s2] sm:$0xff]  ;;  %vm42_vm0 = vcmask 261120   ;;  %v36_v1 = vld [vmem:[%s773_s2 + $0x10] sm:$0xff]  ;;  %v35_v4 = vld [vmem:[%s773_s2 + $0x8] sm:$0xff]  ;;  %vm151_vm1 = vcmask 62464   ;;  %vm196_vm2 = vcmask 64512  }
   0x7   :  { %v30_v2 = vld [vmem:[%s772_s1] sm:$0x3f]  ;;  %464 = vmatpush.xpose.msk.msra.mxu0 %vm42_vm0, %v34_v0  ;;  %468 = vmatpush.xpose.msk.msra.mxu2 %vm42_vm0, %v36_v1  ;;  %v32_v3 = vld [vmem:[%s772_s1 + $0x10] sm:$0x3f]  ;;  %v37_v5 = vld [vmem:[%s773_s2 + $0x18] sm:$0xff]  ;;  %s476_s22 = sld [smem:[#allocation2 + $0x1]] }
   0x8   :  { %466 = vmatpush.xpose.msk.msra.mxu1 %vm42_vm0, %v35_v4  ;;  %470 = vmatpush.xpose.msk.msra.mxu3 %vm42_vm0, %v37_v5  ;;  %v31_v6 = vld [vmem:[%s772_s1 + $0x8] sm:$0x3f]  ;;  %v33_v7 = vld [vmem:[%s772_s1 + $0x18] sm:$0x3f]  ;;  %v38_v40 = vld [vmem:[%s774_s3] sm:$0xff]  ;;  %s477_s23 = sld [smem:[#allocation2 + $0x2]] }
   0x9   :  { %289 = vst.msk [vmem:[%s775_s4] sm:$0xff] %vm42_vm0, %v38_v40  ;;  %s478_s24 = sld [smem:[#allocation2 + $0x3]]  ;;  %vm297_vm3 = vcmask 253952   ;;  %vm302_vm4 = vcmask 254977   ;;  %vm307_vm5 = vcmask 256002   ;;  %vm312_vm6 = vcmask 257027  }
   0xa   :  { %465 = vmatmul.msk.f32.vlgmr.msra.gmra.mxu0 %vm42_vm0, %v30_v2  ;;  %469 = vmatmul.msk.f32.vlgmr.msra.gmra.mxu2 %vm42_vm0, %v32_v3  ;;  %s479_s0 = sld [smem:[#allocation2 + $0x4]]  ;;  %vm317_vm7 = vcmask 258052   ;;  %vm322_vm8 = vcmask 259077  }
   0xb   :  { %467 = vmatmul.msk.f32.vlgmr.msra.gmra.mxu1 %vm42_vm0, %v31_v6  ;;  %471 = vmatmul.msk.f32.vlgmr.msra.gmra.mxu3 %vm42_vm0, %v33_v7  ;;  %s480_s25 = sld [smem:[#allocation2 + $0x5]] }
   0xc   :  { %215 = vmatpush.msrb.mxu0 %v38_v40  ;;  %s648_s29 = sld [smem:[#allocation2 + $0x80]] }
   0xd   :  { %s301_s6 = scalar_lea.vmem %s775_s4, %s476_s22  ;;  %s653_s7 = sld [smem:[#allocation2 + $0x81]] }
   0xe   :  { %s306_s8 = scalar_lea.vmem %s775_s4, %s477_s23  ;;  %s658_s9 = sld [smem:[#allocation2 + $0x82]] }
   0xf   :  { %s311_s12 = scalar_lea.vmem %s775_s4, %s478_s24  ;;  %s664_s13 = sld [smem:[#allocation2 + $0x83]] }
  0x10   :  { %v40_v41 = vld [vmem:[%s774_s3 + $0x10] sm:$0xff]  ;;  %s316_s16 = scalar_lea.vmem %s775_s4, %s479_s0  ;;  %s670_s17 = sld [smem:[#allocation2 + $0x84]] }
  0x11   :  { %261 = vmatpush.msrb.mxu2 %v40_v41  ;;  %291 = vst.msk [vmem:[%s775_s4 + $0x10] sm:$0xff] %vm42_vm0, %v40_v41  ;;  %s321_s20 = scalar_lea.vmem %s775_s4, %s480_s25  ;;  %s491_s21 = sld [smem:[#allocation2 + $0x85]] }
  0x12   :  { %s680_s22 = sld [smem:[#allocation2 + $0x101]]  ;;  %s428_s0 = scalar_lea.vmem %s775_s4, %s648_s29 }
  0x13   :  { %s687_s26 = sld [smem:[#allocation2 + $0x102]] }
  0x14   :  { %s693_s30 = sld [smem:[#allocation2 + $0x103]]  ;;  %s432_s1 = scalar_lea.vmem %s775_s4, %s658_s9 }
  0x15   :  { %s699_s2 = sld [smem:[#allocation2 + $0x104]]  ;;  %s434_s10 = scalar_lea.vmem %s775_s4, %s664_s13 }
  0x16   :  { %s503_s11 = sld [smem:[#allocation2 + $0x105]]  ;;  %s436_s14 = scalar_lea.vmem %s775_s4, %s670_s17 }
  0x17   :  { %s505_s15 = sld [smem:[#allocation2 + $0x180]]  ;;  %s438_s18 = scalar_lea.vmem %s775_s4, %s491_s21 }
  0x18   :  { %v39_v42 = vld [vmem:[%s774_s3 + $0x8] sm:$0xff]  ;;  %s507_s19 = sld [smem:[#allocation2 + $0x181]]  ;;  %s442_s25 = scalar_lea.vmem %s775_s4, %s680_s22 }
  0x19   :  { %238 = vmatpush.msrb.mxu1 %v39_v42  ;;  %290 = vst.msk [vmem:[%s775_s4 + $0x8] sm:$0xff] %vm42_vm0, %v39_v42  ;;  %s509_s24 = sld [smem:[#allocation2 + $0x182]]  ;;  %s444_s5 = scalar_lea.vmem %s775_s4, %s687_s26 }
  0x1a   :  { %s511_s27 = sld [smem:[#allocation2 + $0x183]]  ;;  %s446_s29 = scalar_lea.vmem %s775_s4, %s693_s30 }
  0x1c   :  { %s450_s26 = scalar_lea.vmem %s775_s4, %s503_s11 }
  0x1f   :  { %s456_s17 = scalar_lea.vmem %s775_s4, %s509_s24 }
  0x20   :  { %v41_v43 = vld [vmem:[%s774_s3 + $0x18] sm:$0xff]  ;;  %s295_s3 = sld [smem:[#allocation2]] }
  0x21   :  { %284 = vmatpush.msrb.mxu3 %v41_v43  ;;  %292 = vst.msk [vmem:[%s775_s4 + $0x18] sm:$0xff] %vm42_vm0, %v41_v43 }
  0x26   :  { %s296_s28 = scalar_lea.vmem %s775_s4, %s295_s3  ;;  %s677_s3 = sld [smem:[#allocation2 + $0x100]] }
  0x2c   :  { %s440_s23 = scalar_lea.vmem %s775_s4, %s677_s3 }
  0x87   :  { %v66_v8 = vpop.f32.mrf.mxu0 }
  0x88   :  { %v147_v9 = vmul.f32 0.17677669, %v66_v8  ;;  %v92_v10 = vpop.f32.mrf.mxu1 }
  0x89   :  { %v148_v12 = vmul.f32 0.17677669, %v92_v10 }
  0x8a   :  { %v152_v11 = vsel %vm151_vm1, %v147_v9, -inf }
  0x8b   :  { %153 = vmax.xlane.f32.xlu0 %v152_v11  ;;  %v155_v17 = vsel %vm151_vm1, %v148_v12, -inf }
  0x8d   :  { %v118_v13 = vpop.f32.mrf.mxu2 }
  0x8e   :  { %v149_v14 = vmul.f32 0.17677669, %v118_v13  ;;  %v144_v15 = vpop.f32.mrf.mxu3 }
  0x8f   :  { %v150_v18 = vmul.f32 0.17677669, %v144_v15 }
  0x90   :  { %v158_v16 = vsel %vm151_vm1, %v149_v14, -inf }
  0x91   :  { %159 = vmax.xlane.f32.xlu1 %v158_v16  ;;  %v161_v19 = vsel %vm151_vm1, %v150_v18, -inf }
  0x93   :  { %156 = vmax.xlane.f32.xlu0 %v155_v17 }
  0x99   :  { %162 = vmax.xlane.f32.xlu1 %v161_v19 }
  0xfe   :  { %v154_v20 = vpop.xlane.xlu0 %153 }
  0xff   :  { %v164_v21 = vsub.f32 %v147_v9, %v154_v20 }
 0x101   :  { %v168_v22 = vmul.f32 1.442695, %v164_v21 }
 0x103   :  { %518 = vpow2.f32 %v168_v22 }
 0x104   :  { %v160_v23 = vpop.xlane.xlu1 %159 }
 0x105   :  { %v166_v24 = vsub.f32 %v149_v14, %v160_v23 }
 0x106   :  { %v157_v25 = vpop.xlane.xlu0 %156 }
 0x107   :  { %v172_v26 = vmul.f32 1.442695, %v166_v24  ;;  %v165_v27 = vsub.f32 %v148_v12, %v157_v25 }
 0x109   :  { %v519_v28 = vpop.eup %518  ;;  %520 = vpow2.f32 %v172_v26  ;;  %v170_v29 = vmul.f32 1.442695, %v165_v27 }
 0x10a   :  { %v176_v30 = vsel %vm151_vm1, %v519_v28, 0.0 }
 0x10b   :  { %522 = vpow2.f32 %v170_v29  ;;  %177 = vadd.xlane.f32.xlu2 %v176_v30 }
 0x10c   :  { %v163_v31 = vpop.xlane.xlu1 %162 }
 0x10d   :  { %v167_v32 = vsub.f32 %v150_v18, %v163_v31 }
 0x10f   :  { %v521_v33 = vpop.eup %520  ;;  %v174_v34 = vmul.f32 1.442695, %v167_v32 }
 0x110   :  { %v182_v35 = vsel %vm151_vm1, %v521_v33, 0.0 }
 0x111   :  { %v523_v36 = vpop.eup %522  ;;  %524 = vpow2.f32 %v174_v34  ;;  %183 = vadd.xlane.f32.xlu0 %v182_v35 }
 0x112   :  { %v179_v37 = vsel %vm151_vm1, %v523_v36, 0.0 }
 0x113   :  { %180 = vadd.xlane.f32.xlu2 %v179_v37 }
 0x117   :  { %v525_v38 = vpop.eup %524 }
 0x118   :  { %v185_v39 = vsel %vm151_vm1, %v525_v38, 0.0 }
 0x119   :  { %186 = vadd.xlane.f32.xlu1 %v185_v39 }
 0x17e   :  { %v178_v44 = vpop.xlane.xlu2 %177 }
 0x17f   :  { %526 = vrcp.f32 %v178_v44 }
 0x184   :  { %v184_v45 = vpop.xlane.xlu0 %183 }
 0x185   :  { %v527_v46 = vpop.eup %526  ;;  %528 = vrcp.f32 %v184_v45 }
 0x186   :  { %v181_v47 = vpop.xlane.xlu2 %180  ;;  %v192_v48 = vmul.f32 %v527_v46, %v519_v28 }
 0x187   :  { %530 = vrcp.f32 %v181_v47 }
 0x188   :  { %472 = vmatmul.msk.f32.vlgmr.msrb.gmra.mxu0 %vm196_vm2, %v192_v48 }
 0x18b   :  { %v529_v49 = vpop.eup %528 }
 0x18c   :  { %v194_v50 = vmul.f32 %v529_v49, %v521_v33  ;;  %v187_v51 = vpop.xlane.xlu1 %186 }
 0x18d   :  { %v531_v52 = vpop.eup %530  ;;  %532 = vrcp.f32 %v187_v51 }
 0x18e   :  { %v193_v53 = vmul.f32 %v531_v52, %v523_v36  ;;  %474 = vmatmul.msk.f32.vlgmr.msrb.gmra.mxu2 %vm196_vm2, %v194_v50 }
 0x190   :  { %473 = vmatmul.msk.f32.vlgmr.msrb.gmra.mxu1 %vm196_vm2, %v193_v53 }
 0x193   :  { %v533_v54 = vpop.eup %532 }
 0x194   :  { %v195_v55 = vmul.f32 %v533_v54, %v525_v38 }
 0x196   :  { %475 = vmatmul.msk.f32.vlgmr.msrb.gmra.mxu3 %vm196_vm2, %v195_v55 }
 0x205   :  { %v217_v56 = vpop.f32.mrf.mxu0 }
 0x206   :  { %298 = vst.msk [vmem:[%s296_s28] sm:$0x1] %vm297_vm3, %v217_v56  ;;  %s430_s28 = scalar_lea.vmem %s775_s4, %s653_s7  ;;  %s448_s7 = scalar_lea.vmem %s775_s4, %s699_s2 }
 0x207   :  { %303 = vst.msk [vmem:[%s301_s6 - $0x1] sm:$0x2] %vm302_vm4, %v217_v56  ;;  %s513_s6 = sld [smem:[#allocation2 + $0x184]] }
 0x208   :  { %308 = vst.msk [vmem:[%s306_s8 - $0x2] sm:$0x4] %vm307_vm5, %v217_v56  ;;  %s515_s8 = sld [smem:[#allocation2 + $0x185]] }
 0x209   :  { %313 = vst.msk [vmem:[%s311_s12 - $0x3] sm:$0x8] %vm312_vm6, %v217_v56 }
 0x20a   :  { %318 = vst.msk [vmem:[%s316_s16 - $0x4] sm:$0x10] %vm317_vm7, %v217_v56 }
 0x20b   :  { %323 = vst.msk [vmem:[%s321_s20 - $0x5] sm:$0x20] %vm322_vm8, %v217_v56  ;;  %s454_s20 = scalar_lea.vmem %s775_s4, %s507_s19 }
 0x20d   :  { %v240_v57 = vpop.f32.mrf.mxu1 }
 0x20e   :  { %482 = vst.msk [vmem:[%s428_s0 + $0x8] sm:$0x1] %vm297_vm3, %v240_v57 }
 0x20f   :  { %484 = vst.msk [vmem:[%s430_s28 + $0x7] sm:$0x2] %vm302_vm4, %v240_v57  ;;  %s460_s28 = scalar_lea.vmem %s775_s4, %s513_s6 }
 0x210   :  { %486 = vst.msk [vmem:[%s432_s1 + $0x6] sm:$0x4] %vm307_vm5, %v240_v57  ;;  %s462_s1 = scalar_lea.vmem %s775_s4, %s515_s8 }
 0x211   :  { %488 = vst.msk [vmem:[%s434_s10 + $0x5] sm:$0x8] %vm312_vm6, %v240_v57  ;;  %v263_v58 = vpop.f32.mrf.mxu2 }
 0x212   :  { %490 = vst.msk [vmem:[%s436_s14 + $0x4] sm:$0x10] %vm317_vm7, %v240_v57 }
 0x213   :  { %492 = vst.msk [vmem:[%s438_s18 + $0x3] sm:$0x20] %vm322_vm8, %v240_v57  ;;  %s452_s18 = scalar_lea.vmem %s775_s4, %s505_s15 }
 0x214   :  { %494 = vst.msk [vmem:[%s440_s23 + $0x10] sm:$0x1] %vm297_vm3, %v263_v58 }
 0x215   :  { %496 = vst.msk [vmem:[%s442_s25 + $0xf] sm:$0x2] %vm302_vm4, %v263_v58  ;;  %s458_s25 = scalar_lea.vmem %s775_s4, %s511_s27 }
 0x216   :  { %498 = vst.msk [vmem:[%s444_s5 + $0xe] sm:$0x4] %vm307_vm5, %v263_v58 }
 0x217   :  { %500 = vst.msk [vmem:[%s446_s29 + $0xd] sm:$0x8] %vm312_vm6, %v263_v58 }
 0x218   :  { %502 = vst.msk [vmem:[%s448_s7 + $0xc] sm:$0x10] %vm317_vm7, %v263_v58 }
 0x219   :  { %504 = vst.msk [vmem:[%s450_s26 + $0xb] sm:$0x20] %vm322_vm8, %v263_v58  ;;  %v286_v59 = vpop.f32.mrf.mxu3 }
 0x21a   :  { %506 = vst.msk [vmem:[%s452_s18 + $0x18] sm:$0x1] %vm297_vm3, %v286_v59 }
 0x21b   :  { %508 = vst.msk [vmem:[%s454_s20 + $0x17] sm:$0x2] %vm302_vm4, %v286_v59 }
 0x21c   :  { %510 = vst.msk [vmem:[%s456_s17 + $0x16] sm:$0x4] %vm307_vm5, %v286_v59 }
 0x21d   :  { %512 = vst.msk [vmem:[%s458_s25 + $0x15] sm:$0x8] %vm312_vm6, %v286_v59 }
 0x21e   :  { %514 = vst.msk [vmem:[%s460_s28 + $0x14] sm:$0x10] %vm317_vm7, %v286_v59 }
 0x21f   :  { %516 = vst.msk [vmem:[%s462_s1 + $0x13] sm:$0x20] %vm322_vm8, %v286_v59 }
 0x220   :  { %421 = vsyncpa [#allocation3], 1 }

</bundles_post_ra>
